<compile_context>
chip_gen: v5e
topology: v5e:2x2
jax: 0.10.0
libtpu: 0.0.40
codegen_flags: <defaults>
</compile_context>

<pallas_src>
import math

import jax
import jax.numpy as jnp
from jax.experimental import pallas as pl
from jax.experimental.pallas import tpu as pltpu


_LANES = 128
_MAX_BLOCK_ROWS = 2048                 # (2048,128) f32 x 4 inputs x 2 buffers = 8 MiB
_VMEM_INPUT_BUDGET = 16 * 1024 * 1024  # budget for double-buffered input tiles


def _sublane_tile(dtype):
    """Second-minor tiling requirement for a dtype streamed in native width."""
    return {4: 8, 2: 16, 1: 32}.get(jnp.dtype(dtype).itemsize, 8)


def _make_bce_distill_kernel(has_mask, needs_valid, block_rows, blocks_per_shard,
                             n_blocks, rem_last, bg_factor, t_posw_m1, g_posw_m1):
    """Builds the kernel, specialized on static config.

    Scalar-prefetch ref layout (f32, shape (4,)):
      [0] gt_shift  [1] gt_scale  [2] teacher_shift  [3] teacher_scale
    """
    sub_blocks = block_rows // 8

    def kernel(scal_ref, *refs):
        if has_mask:
            x_ref, t_ref, g_ref, m_ref, tacc_ref, gacc_ref = refs
        else:
            x_ref, t_ref, g_ref, tacc_ref, gacc_ref = refs

        c = pl.program_id(0)   # shard axis (megacore-parallel)
        i = pl.program_id(1)   # streaming / reduction axis

        @pl.when(i == 0)
        def _():
            tacc_ref[...] = jnp.zeros_like(tacc_ref)
            gacc_ref[...] = jnp.zeros_like(gacc_ref)

        g_shift, g_scale = scal_ref[0], scal_ref[1]
        t_shift, t_scale = scal_ref[2], scal_ref[3]

        x = x_ref[...].astype(jnp.float32)                         # student logits
        t = (t_ref[...].astype(jnp.float32) - t_shift) * t_scale   # teacher target in [0, 1]
        g = (g_ref[...].astype(jnp.float32) - g_shift) * g_scale   # gt target in [0, 1]

        if has_mask:
            m = m_ref[...].astype(jnp.float32)
            # keypoint mining: background (normalized gt == 0) positions get mask scaled down
            m = jnp.where(g == 0.0, m * bg_factor, m)
            xm, tm, gm = x * m, t * m, g * m
        else:
            xm, tm, gm = x, t, g

        # numerically-stable softplus(-x); BCEWithLogits(x, y, pos_weight=p):
        #   loss = (1 - y)*x + (1 + (p - 1)*y)*softplus(-x)
        #        = (x + softplus(-x)) + y*((p - 1)*softplus(-x) - x)
        sp = jnp.maximum(-xm, 0.0) + jnp.log1p(jnp.exp(-jnp.abs(xm)))
        base = xm + sp

        def bce(y, posw_m1):
            if posw_m1 == 0.0:            # pos_weight == 1: drop the multiply entirely
                return base - y * xm
            return base + y * (posw_m1 * sp - xm)

        t_loss = bce(tm, t_posw_m1)
        g_loss = bce(gm, g_posw_m1)

        def accumulate(tl, gl):
            # in-register block reduce to one (8,128) vreg per loss; no cross-lane work
            tacc_ref[...] += jnp.sum(tl.reshape(sub_blocks, 8, _LANES), axis=0)
            gacc_ref[...] += jnp.sum(gl.reshape(sub_blocks, 8, _LANES), axis=0)

        if needs_valid:
            # only the (globally) last block contains padded / out-of-range elements
            is_last = (c * blocks_per_shard + i) == (n_blocks - 1)

            @pl.when(is_last)
            def _():
                ridx = jax.lax.broadcasted_iota(jnp.int32, (block_rows, _LANES), 0)
                lidx = jax.lax.broadcasted_iota(jnp.int32, (block_rows, _LANES), 1)
                valid = (ridx * _LANES + lidx) < rem_last   # block-local idx: no i32 overflow
                accumulate(jnp.where(valid, t_loss, 0.0),
                           jnp.where(valid, g_loss, 0.0))

            @pl.when(jnp.logical_not(is_last))
            def _():
                accumulate(t_loss, g_loss)
        else:
            accumulate(t_loss, g_loss)

    return kernel


def distillation_bce_loss_keypoint_mining(
    student_pred,
    teacher_pred,
    gt,
    alpha=0.5,
    mask=None,
    background_factor=0.0,
    teacher_pos_weight=1.0,
    gt_pos_weight=1.0,
):
    assert 0.0 <= alpha <= 1.0, "alpha must be in range [0, 1]"
    assert 0.0 <= background_factor <= 1.0

    has_mask = mask is not None
    arrays = [student_pred, teacher_pred, gt] + ([mask] if has_mask else [])

    n_elems = math.prod(student_pred.shape)
    req_sub = max(_sublane_tile(a.dtype) for a in arrays)
    rows_exact = -(-n_elems // _LANES)

    if n_elems % _LANES == 0:
        rows = rows_exact          # pure reshape, no copy; last block may be ragged
        pad_elems = 0
    else:
        # Only hit when n_elems % 128 != 0: pad to a sublane-tile-aligned row count.
        # TODO(synk): this jnp.pad is a full copy; a copy-free path for non-128-divisible
        # inputs would need 1-D blocks or a manual DMA of the ragged tail.
        rows = -(-rows_exact // req_sub) * req_sub
        pad_elems = rows * _LANES - n_elems

    # --- tiling: biggest blocks that fit the VMEM budget, dtype-aware sublane rounding ---
    bytes_per_row = 2 * _LANES * sum(jnp.dtype(a.dtype).itemsize for a in arrays)
    cap = max(req_sub, min(_MAX_BLOCK_ROWS, _VMEM_INPUT_BUDGET // bytes_per_row))
    block_rows = -(-min(cap, rows) // req_sub) * req_sub

    n_blocks = -(-rows // block_rows)
    # shard across 2 TCs (v7x megacore) only if each shard gets >=2 full blocks and the
    # split creates no phantom (fully out-of-range) block; harmless no-op on v5e/v6e.
    n_shards = 2 if (n_blocks >= 4 and n_blocks % 2 == 0) else 1
    blocks_per_shard = n_blocks // n_shards

    covered_elems = n_blocks * block_rows * _LANES
    needs_valid = covered_elems != n_elems
    rem_last = n_elems - (n_blocks - 1) * block_rows * _LANES  # valid elems in last block (static)

    # --- no_grad normalization statistics (scalar preprocessing, plain JAX) ---
    gmin = jnp.min(gt).astype(jnp.float32)
    gmax = jnp.max(gt).astype(jnp.float32)
    g_shift = jnp.where(gmin < 0, gmin, 0.0)
    g_den = gmax - g_shift
    g_scale = jnp.where(g_den > 1, 1.0 / g_den, 1.0)

    tmin = jnp.min(teacher_pred).astype(jnp.float32)
    tmax = jnp.max(teacher_pred).astype(jnp.float32)
    t_shift = jnp.where(tmin < 0, tmin, 0.0)
    t_den = tmax - t_shift
    t_scale = jnp.where(t_den > 1, 1.0 / t_den, 1.0)

    scalars = jnp.stack([g_shift, g_scale, t_shift, t_scale]).astype(jnp.float32)

    def to2d(a):
        flat = a.reshape(-1)                       # contiguous reshape: free
        if pad_elems:
            flat = jnp.pad(flat, (0, pad_elems))   # only when n_elems % 128 != 0
        return flat.reshape(rows, _LANES)

    inputs = [to2d(a) for a in arrays]

    in_blk = lambda c, i, s: (c * blocks_per_shard + i, 0)
    out_blk = lambda c, i, s: (c, 0)

    kernel = _make_bce_distill_kernel(
        has_mask, needs_valid, block_rows, blocks_per_shard, n_blocks, rem_last,
        float(background_factor), float(teacher_pos_weight) - 1.0,
        float(gt_pos_weight) - 1.0,
    )

    in_bytes = sum(int(a.size) * a.dtype.itemsize for a in inputs)
    out_bytes = 2 * n_shards * 8 * _LANES * 4
    cost = pl.CostEstimate(
        flops=25 * covered_elems,
        transcendentals=2 * covered_elems,
        bytes_accessed=in_bytes + out_bytes,
    )

    in_vmem = 2 * block_rows * _LANES * sum(jnp.dtype(a.dtype).itemsize for a in arrays)
    vmem_limit = min(32 << 20, int(in_vmem) + (8 << 20))   # safe on v5e/v6e/v7x

    grid_spec = pltpu.PrefetchScalarGridSpec(
        num_scalar_prefetch=1,
        grid=(n_shards, blocks_per_shard),
        in_specs=[pl.BlockSpec((block_rows, _LANES), in_blk)] * len(inputs),
        out_specs=[
            pl.BlockSpec((8, _LANES), out_blk),
            pl.BlockSpec((8, _LANES), out_blk),
        ],
    )

    tacc, gacc = pl.pallas_call(
        kernel,
        out_shape=(
            jax.ShapeDtypeStruct((n_shards * 8, _LANES), jnp.float32),
            jax.ShapeDtypeStruct((n_shards * 8, _LANES), jnp.float32),
        ),
        grid_spec=grid_spec,
        compiler_params=pltpu.CompilerParams(
            dimension_semantics=("parallel", "arbitrary"),
            vmem_limit_bytes=vmem_limit,
        ),
        cost_estimate=cost,
    )(scalars, *inputs)

    inv_n = 1.0 / n_elems
    teacher_loss = jnp.sum(tacc) * inv_n
    gt_loss = jnp.sum(gacc) * inv_n
    # TODO(synk): pick_top is not implemented (it raises NotImplementedError in the PyTorch module).
    return alpha * teacher_loss + (1.0 - alpha) * gt_loss


def _reference(student, teacher, gt, alpha, mask, bg_factor, tpw, gpw):
    """Pure-JAX mirror of the PyTorch forward, for correctness checking."""
    gmin = gt.min()
    gt = jnp.where(gmin < 0, gt - gmin, gt)
    gmax = gt.max()
    gt = jnp.where(gmax > 1, gt / gmax, gt)
    tmin = teacher.min()
    teacher = jnp.where(tmin < 0, teacher - tmin, teacher)
    tmax = teacher.max()
    teacher = jnp.where(tmax > 1, teacher / tmax, teacher)
    if mask is not None:
        mask = jnp.where(gt == 0, mask * bg_factor, mask)

    def bce(x, y, m, p):
        if m is not None:
            x = x * m
            y = y * m
        sp = jnp.maximum(-x, 0.0) + jnp.log1p(jnp.exp(-jnp.abs(x)))
        return ((1.0 - y) * x + (1.0 + (p - 1.0) * y) * sp).mean()

    return alpha * bce(student, teacher, mask, tpw) + (1.0 - alpha) * bce(
        student, gt, mask, gpw
    )


if __name__ == "__main__":
    key = jax.random.PRNGKey(0)
    k1, k2, k3, k4 = jax.random.split(key, 4)

    # 1) masked, 128-divisible small NCHW case (single block, no validity path)
    N, C, H, W = 2, 4, 16, 16
    student_pred = jax.random.normal(k1, (N, C, H, W), jnp.float32)           # logits
    teacher_pred = 2.0 * jax.random.normal(k2, (N, C, H, W), jnp.float32)     # needs normalization
    gt = jnp.maximum(
        jax.random.uniform(k3, (N, C, H, W), jnp.float32, minval=-0.5, maxval=2.0), 0.0
    )  # heatmap-ish target with exact zeros (background) and max > 1
    mask = (jax.random.uniform(k4, (N, C, H, W)) > 0.3).astype(jnp.float32)

    out = distillation_bce_loss_keypoint_mining(
        student_pred, teacher_pred, gt,
        alpha=0.3, mask=mask, background_factor=0.25,
        teacher_pos_weight=2.0, gt_pos_weight=1.5,
    )
    out = jax.block_until_ready(out)
    ref = _reference(student_pred, teacher_pred, gt, 0.3, mask, 0.25, 2.0, 1.5)
    assert jnp.allclose(out, ref, rtol=1e-5, atol=1e-5), (out, ref)

    # 2) mask=None, non-128-divisible shape (lane pad + validity mask on the last/only block)
    shp2 = (2, 17, 15, 15)
    s2 = jax.random.normal(k1, shp2, jnp.float32)
    t2 = 1.5 * jax.random.normal(k2, shp2, jnp.float32)
    g2 = jnp.maximum(jax.random.uniform(k3, shp2, jnp.float32, minval=-0.2, maxval=1.5), 0.0)
    out2 = distillation_bce_loss_keypoint_mining(
        s2, t2, g2, alpha=0.6, mask=None, teacher_pos_weight=1.0, gt_pos_weight=2.0
    )
    out2 = jax.block_until_ready(out2)
    ref2 = _reference(s2, t2, g2, 0.6, None, 0.0, 1.0, 2.0)
    assert jnp.allclose(out2, ref2, rtol=1e-5, atol=1e-5), (out2, ref2)

    # 3) multi-block + 2-shard + ragged (un-padded) last block:
    #    6150 rows -> 4 x (2048,128) blocks, 2 shards, last block has 6 valid rows
    shp3 = (2, 3, 1025, 128)
    s3 = jax.random.normal(k2, shp3, jnp.float32)
    t3 = jax.random.normal(k3, shp3, jnp.float32)
    g3 = jnp.maximum(jax.random.uniform(k4, shp3, jnp.float32, minval=-0.5, maxval=2.0), 0.0)
    m3 = (jax.random.uniform(k1, shp3) > 0.5).astype(jnp.float32)
    out3 = distillation_bce_loss_keypoint_mining(
        s3, t3, g3, alpha=0.5, mask=m3, background_factor=0.1,
        teacher_pos_weight=3.0, gt_pos_weight=1.0,
    )
    out3 = jax.block_until_ready(out3)
    ref3 = _reference(s3, t3, g3, 0.5, m3, 0.1, 3.0, 1.0)
    assert jnp.allclose(out3, ref3, rtol=1e-4, atol=1e-5), (out3, ref3)

    print("KERNEL_OK")
</pallas_src>

<mosaic_0001>
module attributes {stable_mosaic.version = 11 : i64} {
  func.func @kernel(%arg0: i32, %arg1: i32, %arg2: memref<4xf32, #tpu.memory_space<smem>>, %arg3: memref<16x128xf32, #tpu.memory_space<vmem>>, %arg4: memref<16x128xf32, #tpu.memory_space<vmem>>, %arg5: memref<16x128xf32, #tpu.memory_space<vmem>>, %arg6: memref<16x128xf32, #tpu.memory_space<vmem>>, %arg7: memref<8x128xf32, #tpu.memory_space<vmem>>, %arg8: memref<8x128xf32, #tpu.memory_space<vmem>>) attributes {dimension_semantics = [#tpu.dimension_semantics<parallel>, #tpu.dimension_semantics<arbitrary>], iteration_bounds = array<i64: 1, 1>, scalar_prefetch = 1 : i64, scratch_operands = 0 : i64, tpu.core_type = #tpu.core_type<tc>, window_params = [{transform_indices = @transform_0, window_bounds = array<i64: 16, 128>}, {transform_indices = @transform_1, window_bounds = array<i64: 16, 128>}, {transform_indices = @transform_2, window_bounds = array<i64: 16, 128>}, {transform_indices = @transform_3, window_bounds = array<i64: 16, 128>}, {transform_indices = @transform_4, window_bounds = array<i64: 8, 128>}, {transform_indices = @transform_5, window_bounds = array<i64: 8, 128>}]} {
    %c0_i32 = arith.constant 0 : i32
    %0 = arith.cmpi eq, %arg1, %c0_i32 : i32
    %1 = arith.extui %0 : i1 to i32
    %c0_i32_0 = arith.constant 0 : i32
    %2 = arith.cmpi ne, %1, %c0_i32_0 : i32
    scf.if %2 {
      %cst_25 = arith.constant 0.000000e+00 : f32
      %58 = vector.broadcast %cst_25 : f32 to vector<8x128xf32>
      %c0_26 = arith.constant 0 : index
      %c0_27 = arith.constant 0 : index
      %59 = vector.load %arg7[%c0_26, %c0_27] : memref<8x128xf32, #tpu.memory_space<vmem>>, vector<8x128xf32>
      tpu.vector_store %arg7[%c0_26, %c0_27], %58 {strides = array<i32>} : memref<8x128xf32, #tpu.memory_space<vmem>>, vector<8x128xf32>,
      %cst_28 = arith.constant 0.000000e+00 : f32
      %60 = vector.broadcast %cst_28 : f32 to vector<8x128xf32>
      %c0_29 = arith.constant 0 : index
      %c0_30 = arith.constant 0 : index
      %61 = vector.load %arg8[%c0_29, %c0_30] : memref<8x128xf32, #tpu.memory_space<vmem>>, vector<8x128xf32>
      tpu.vector_store %arg8[%c0_29, %c0_30], %60 {strides = array<i32>} : memref<8x128xf32, #tpu.memory_space<vmem>>, vector<8x128xf32>,
    } else {
    }
    %c0 = arith.constant 0 : index
    %3 = memref.load %arg2[%c0] : memref<4xf32, #tpu.memory_space<smem>>
    %c1 = arith.constant 1 : index
    %4 = memref.load %arg2[%c1] : memref<4xf32, #tpu.memory_space<smem>>
    %c2 = arith.constant 2 : index
    %5 = memref.load %arg2[%c2] : memref<4xf32, #tpu.memory_space<smem>>
    %c3 = arith.constant 3 : index
    %6 = memref.load %arg2[%c3] : memref<4xf32, #tpu.memory_space<smem>>
    %c0_1 = arith.constant 0 : index
    %c0_2 = arith.constant 0 : index
    %7 = vector.load %arg3[%c0_1, %c0_2] : memref<16x128xf32, #tpu.memory_space<vmem>>, vector<16x128xf32>
    %c0_3 = arith.constant 0 : index
    %c0_4 = arith.constant 0 : index
    %8 = vector.load %arg4[%c0_3, %c0_4] : memref<16x128xf32, #tpu.memory_space<vmem>>, vector<16x128xf32>
    %9 = vector.broadcast %5 : f32 to vector<16x128xf32>
    %10 = arith.subf %8, %9 : vector<16x128xf32>
    %11 = vector.broadcast %6 : f32 to vector<16x128xf32>
    %12 = arith.mulf %10, %11 : vector<16x128xf32>
    %c0_5 = arith.constant 0 : index
    %c0_6 = arith.constant 0 : index
    %13 = vector.load %arg5[%c0_5, %c0_6] : memref<16x128xf32, #tpu.memory_space<vmem>>, vector<16x128xf32>
    %14 = vector.broadcast %3 : f32 to vector<16x128xf32>
    %15 = arith.subf %13, %14 : vector<16x128xf32>
    %16 = vector.broadcast %4 : f32 to vector<16x128xf32>
    %17 = arith.mulf %15, %16 : vector<16x128xf32>
    %c0_7 = arith.constant 0 : index
    %c0_8 = arith.constant 0 : index
    %18 = vector.load %arg6[%c0_7, %c0_8] : memref<16x128xf32, #tpu.memory_space<vmem>>, vector<16x128xf32>
    %cst = arith.constant 0.000000e+00 : f32
    %19 = vector.broadcast %cst : f32 to vector<16x128xf32>
    %20 = arith.cmpf oeq, %17, %19 : vector<16x128xf32>
    %cst_9 = arith.constant 2.500000e-01 : f32
    %21 = vector.broadcast %cst_9 : f32 to vector<16x128xf32>
    %22 = arith.mulf %18, %21 : vector<16x128xf32>
    %23 = arith.select %20, %22, %18 : vector<16x128xi1>, vector<16x128xf32>
    %24 = arith.mulf %7, %23 : vector<16x128xf32>
    %25 = arith.mulf %12, %23 : vector<16x128xf32>
    %26 = arith.mulf %17, %23 : vector<16x128xf32>
    %cst_10 = arith.constant 0.000000e+00 : f32
    %27 = vector.broadcast %cst_10 : f32 to vector<16x128xf32>
    %28 = arith.subf %27, %24 : vector<16x128xf32>
    %cst_11 = arith.constant 0.000000e+00 : f32
    %29 = vector.broadcast %cst_11 : f32 to vector<16x128xf32>
    %30 = arith.maximumf %28, %29 : vector<16x128xf32>
    %31 = math.absf %24 : vector<16x128xf32>
    %cst_12 = arith.constant 0.000000e+00 : f32
    %32 = vector.broadcast %cst_12 : f32 to vector<16x128xf32>
    %33 = arith.subf %32, %31 : vector<16x128xf32>
    %34 = math.exp %33 : vector<16x128xf32>
    %35 = math.log1p %34 : vector<16x128xf32>
    %36 = arith.addf %30, %35 : vector<16x128xf32>
    %37 = arith.addf %24, %36 : vector<16x128xf32>
    %cst_13 = arith.constant 1.000000e+00 : f32
    %38 = vector.broadcast %cst_13 : f32 to vector<16x128xf32>
    %39 = arith.mulf %38, %36 : vector<16x128xf32>
    %40 = arith.subf %39, %24 : vector<16x128xf32>
    %41 = arith.mulf %25, %40 : vector<16x128xf32>
    %42 = arith.addf %37, %41 : vector<16x128xf32>
    %cst_14 = arith.constant 5.000000e-01 : f32
    %43 = vector.broadcast %cst_14 : f32 to vector<16x128xf32>
    %44 = arith.mulf %43, %36 : vector<16x128xf32>
    %45 = arith.subf %44, %24 : vector<16x128xf32>
    %46 = arith.mulf %26, %45 : vector<16x128xf32>
    %47 = arith.addf %37, %46 : vector<16x128xf32>
    %c0_15 = arith.constant 0 : index
    %c0_16 = arith.constant 0 : index
    %48 = vector.load %arg7[%c0_15, %c0_16] : memref<8x128xf32, #tpu.memory_space<vmem>>, vector<8x128xf32>
    %49 = vector.shape_cast %42 : vector<16x128xf32> to vector<2x8x128xf32>
    %cst_17 = arith.constant dense<0.000000e+00> : vector<8x128xf32>
    %50 = vector.multi_reduction <add>, %49, %cst_17 [0] : vector<2x8x128xf32> to vector<8x128xf32>
    %51 = arith.addf %48, %50 : vector<8x128xf32>
    %c0_18 = arith.constant 0 : index
    %c0_19 = arith.constant 0 : index
    %52 = vector.load %arg7[%c0_18, %c0_19] : memref<8x128xf32, #tpu.memory_space<vmem>>, vector<8x128xf32>
    tpu.vector_store %arg7[%c0_18, %c0_19], %51 {strides = array<i32>} : memref<8x128xf32, #tpu.memory_space<vmem>>, vector<8x128xf32>,
    %c0_20 = arith.constant 0 : index
    %c0_21 = arith.constant 0 : index
    %53 = vector.load %arg8[%c0_20, %c0_21] : memref<8x128xf32, #tpu.memory_space<vmem>>, vector<8x128xf32>
    %54 = vector.shape_cast %47 : vector<16x128xf32> to vector<2x8x128xf32>
    %cst_22 = arith.constant dense<0.000000e+00> : vector<8x128xf32>
    %55 = vector.multi_reduction <add>, %54, %cst_22 [0] : vector<2x8x128xf32> to vector<8x128xf32>
    %56 = arith.addf %53, %55 : vector<8x128xf32>
    %c0_23 = arith.constant 0 : index
    %c0_24 = arith.constant 0 : index
    %57 = vector.load %arg8[%c0_23, %c0_24] : memref<8x128xf32, #tpu.memory_space<vmem>>, vector<8x128xf32>
    tpu.vector_store %arg8[%c0_23, %c0_24], %56 {strides = array<i32>} : memref<8x128xf32, #tpu.memory_space<vmem>>, vector<8x128xf32>,
    return
  }
  func.func @transform_0(%arg0: i32, %arg1: i32, %arg2: memref<4xf32, #tpu.memory_space<smem>>) -> (i32, i32) {
    %c1_i32 = arith.constant 1 : i32
    %0 = arith.muli %arg0, %c1_i32 : i32
    %1 = arith.addi %0, %arg1 : i32
    %c0_i32 = arith.constant 0 : i32
    %c0_i32_0 = arith.constant 0 : i32
    return %1, %c0_i32 : i32, i32
  }
  func.func @transform_1(%arg0: i32, %arg1: i32, %arg2: memref<4xf32, #tpu.memory_space<smem>>) -> (i32, i32) {
    %c1_i32 = arith.constant 1 : i32
    %0 = arith.muli %arg0, %c1_i32 : i32
    %1 = arith.addi %0, %arg1 : i32
    %c0_i32 = arith.constant 0 : i32
    %c0_i32_0 = arith.constant 0 : i32
    return %1, %c0_i32 : i32, i32
  }
  func.func @transform_2(%arg0: i32, %arg1: i32, %arg2: memref<4xf32, #tpu.memory_space<smem>>) -> (i32, i32) {
    %c1_i32 = arith.constant 1 : i32
    %0 = arith.muli %arg0, %c1_i32 : i32
    %1 = arith.addi %0, %arg1 : i32
    %c0_i32 = arith.constant 0 : i32
    %c0_i32_0 = arith.constant 0 : i32
    return %1, %c0_i32 : i32, i32
  }
  func.func @transform_3(%arg0: i32, %arg1: i32, %arg2: memref<4xf32, #tpu.memory_space<smem>>) -> (i32, i32) {
    %c1_i32 = arith.constant 1 : i32
    %0 = arith.muli %arg0, %c1_i32 : i32
    %1 = arith.addi %0, %arg1 : i32
    %c0_i32 = arith.constant 0 : i32
    %c0_i32_0 = arith.constant 0 : i32
    return %1, %c0_i32 : i32, i32
  }
  func.func @transform_4(%arg0: i32, %arg1: i32, %arg2: memref<4xf32, #tpu.memory_space<smem>>) -> (i32, i32) {
    %c0_i32 = arith.constant 0 : i32
    %c0_i32_0 = arith.constant 0 : i32
    return %arg0, %c0_i32 : i32, i32
  }
  func.func @transform_5(%arg0: i32, %arg1: i32, %arg2: memref<4xf32, #tpu.memory_space<smem>>) -> (i32, i32) {
    %c0_i32 = arith.constant 0 : i32
    %c0_i32_0 = arith.constant 0 : i32
    return %arg0, %c0_i32 : i32, i32
  }
}

</mosaic_0001>

<bundles_post_ra>
// kernel: tpu_custom_call.1
= control target key start
LH: loop header
LB: loop body
LE: loop exit
PB: predicated region body
PF: predicated region fallthrough
CT: control target
= control target key end

     0   :  { %s439_s24 = smov [#allocation3]   ;;  %s522_s0 = inlined_call_operand.hbm [shape: f32[4], index: 0, kind: input, shape index: {}]   ;;  %s523_s1 = inlined_call_operand.hbm [shape: f32[16,128], index: 1, kind: input, shape index: {}]   ;;  %s524_s2 = inlined_call_operand.hbm [shape: f32[16,128], index: 2, kind: input, shape index: {}]   ;;  %s525_s3 = inlined_call_operand.hbm [shape: f32[16,128], index: 3, kind: input, shape index: {}]   ;;  %s526_s4 = inlined_call_operand.hbm [shape: f32[16,128], index: 4, kind: input, shape index: {}]   ;;  %s527_s5 = inlined_call_operand.hbm [shape: f32[8,128], index: 5, kind: output, shape index: {0}]   ;;  %s528_s6 = inlined_call_operand.hbm [shape: f32[8,128], index: 6, kind: output, shape index: {1}]  }
   0x1   :  { %s13_s23 = sshll.u32 %s522_s0, 4  ;;  %s14_s23 = int_to_ptr.hbm [resolvable:$true] %s13_s23 }
   0x2   :  { %16 = dma.hbm_to_smem %s14_s23, 16, %s439_s24, [#allocation2] }
   0x3   :  { %427 = dma.done.wait [#allocation2], 16 }
   0x4   :  { %428 = vsyncadd [#allocation2], 4294967280 }
   0x5   :  { %19 = sfence }
   0x6   :  { %20 = vsyncpa [#allocation5], 0 }
   0x7   :  { %21 = vsyncpa [#allocation8], 0 }
   0x8   :  { %22 = vsyncpa [#allocation11], 0 }
   0x9   :  { %23 = vsyncpa [#allocation6], 0 }
   0xa   :  { %24 = vsyncpa [#allocation14], 0  ;;  %s50_s27 = sshll.u32 %s524_s2, 4  ;;  %s440_s28 = smov [#allocation7]   ;;  %s51_s27 = int_to_ptr.hbm [resolvable:$true] %s50_s27 }
   0xb   :  { %s52_s29 = sshll.u32 %s440_s28, 4  ;;  %s33_s7 = sshll.u32 %s523_s1, 4  ;;  %s53_s29 = int_to_ptr.vmem [resolvable:$true] %s52_s29  ;;  %s34_s7 = int_to_ptr.hbm [resolvable:$true] %s33_s7 }
   0xc   :  { %s441_s8 = smov 128   ;;  %s442_s9 = smov 8  }
   0xd   :  { %58 = dma.hbm_to_vmem [thread:$0]  %s51_s27, 256, %s53_s29, [#allocation8], %s441_s8, %s441_s8, %s442_s9  }
   0xe   :  { %s443_s10 = smov [#allocation4]   ;;  %s67_s14 = sshll.u32 %s525_s3, 4  ;;  %s68_s14 = int_to_ptr.hbm [resolvable:$true] %s67_s14 }
   0xf   :  { %s35_s11 = sshll.u32 %s443_s10, 4  ;;  %s84_s16 = sshll.u32 %s526_s4, 4  ;;  %s36_s11 = int_to_ptr.vmem [resolvable:$true] %s35_s11  ;;  %s85_s16 = int_to_ptr.hbm [resolvable:$true] %s84_s16 }
  0x10   :  { %41 = dma.hbm_to_vmem [thread:$0]  %s34_s7, 256, %s36_s11, [#allocation5], %s441_s8, %s441_s8, %s442_s9  }
  0x11   :  { %s444_s17 = smov [#allocation9]   ;;  %s445_s1 = smov [#allocation10]  }
  0x12   :  { %s69_s18 = sshll.u32 %s444_s17, 4  ;;  %s86_s19 = sshll.u32 %s445_s1, 4  ;;  %s70_s18 = int_to_ptr.vmem [resolvable:$true] %s69_s18  ;;  %s87_s19 = int_to_ptr.vmem [resolvable:$true] %s86_s19 }
  0x13   :  { %75 = dma.hbm_to_vmem [thread:$0]  %s68_s14, 256, %s70_s18, [#allocation8], %s441_s8, %s441_s8, %s442_s9  }
  0x14   :  { %92 = dma.hbm_to_vmem [thread:$0]  %s85_s16, 256, %s87_s19, [#allocation11], %s441_s8, %s441_s8, %s442_s9  }
  0x15   :  { %429 = dma.done.wait [#allocation5], 256  }
  0x16   :  { %430 = vsyncadd [#allocation5], 4294967040 }
  0x17   :  { %431 = dma.done.wait [#allocation8], 512  }
  0x18   :  { %432 = vsyncadd [#allocation8], 4294966784 }
  0x19   :  { %433 = dma.done.wait [#allocation11], 256  }
  0x1a   :  { %434 = vsyncadd [#allocation11], 4294967040  ;;  %s123_s3 = sld [smem:[#allocation3]]  ;;  %v137_v1 = vld [vmem:[#allocation9] sm:$0xff]  ;;  %v138_v2 = vld [vmem:[#allocation9 + $0x8] sm:$0xff]  ;;  %s446_s22 = smov [#allocation12]  }
  0x1b   :  { %s250_s20 = sld [smem:[#allocation3 + $0x1]]  ;;  %v145_v6 = vld [vmem:[#allocation10] sm:$0xff]  ;;  %v146_v7 = vld [vmem:[#allocation10 + $0x8] sm:$0xff]  ;;  %v127_v12 = vld [vmem:[#allocation4] sm:$0xff]  ;;  %s220_s23 = sshll.u32 %s446_s22, 4  ;;  %s221_s23 = int_to_ptr.vmem [resolvable:$true] %s220_s23 }
  0x1c   :  { %v149_v8 = vmul.f32 0.25, %v145_v6  ;;  %v150_v11 = vmul.f32 0.25, %v146_v7  ;;  %v128_v13 = vld [vmem:[#allocation4 + $0x8] sm:$0xff]  ;;  %s251_s4 = sld [smem:[#allocation3 + $0x2]]  ;;  %v129_v28 = vld [vmem:[#allocation7] sm:$0xff]  ;;  %v130_v32 = vld [vmem:[#allocation7 + $0x8] sm:$0xff] }
  0x1d   :  { %s252_s21 = sld [smem:[#allocation3 + $0x3]]  ;;  %s222_s26 = sshll.u32 %s527_s5, 4  ;;  %s223_s26 = int_to_ptr.hbm [resolvable:$true] %s222_s26 }
  0x1e   :  { %s447_s27 = smov [#allocation13]   ;;  %s233_s30 = sshll.u32 %s528_s6, 4  ;;  %s234_s30 = int_to_ptr.hbm [resolvable:$true] %s233_s30 }
  0x1f   :  { %s231_s28 = sshll.u32 %s447_s27, 4  ;;  %s232_s28 = int_to_ptr.vmem [resolvable:$true] %s231_s28 }
  0x20   :  { %v139_v0 = vstv %s123_s3 }
  0x21   :  { %v142_v3 = vstv %s250_s20  ;;  %v140_v4 = vsub.f32 %v137_v1, %v139_v0  ;;  %v141_v5 = vsub.f32 %v138_v2, %v139_v0 }
  0x22   :  { %v131_v29 = vstv %s251_s4 }
  0x23   :  { %v143_v9 = vmul.f32 %v142_v3, %v140_v4  ;;  %v498_v10 = vmul.f32 %v142_v3, %v141_v5  ;;  %v132_v34 = vsub.f32 %v129_v28, %v131_v29  ;;  %v133_v38 = vsub.f32 %v130_v32, %v131_v29 }
  0x24   :  { %v134_v39 = vstv %s252_s21 }
  0x25   :  { %vm147_vm0 = vcmp.eq.f32.partialorder %v143_v9, 0.0  ;;  %vm148_vm1 = vcmp.eq.f32.partialorder %v498_v10, 0.0  ;;  %v135_v44 = vmul.f32 %v134_v39, %v132_v34  ;;  %v136_v48 = vmul.f32 %v134_v39, %v133_v38 }
  0x26   :  { %v151_v14 = vsel %vm147_vm0, %v149_v8, %v145_v6  ;;  %v152_v15 = vsel %vm148_vm1, %v150_v11, %v146_v7 }
  0x27   :  { %v501_v16 = vmul.f32 %v151_v14, %v127_v12  ;;  %v503_v17 = vmul.f32 %v152_v15, %v128_v13  ;;  %v155_v53 = vmul.f32 %v151_v14, %v135_v44  ;;  %v156_v56 = vmul.f32 %v152_v15, %v136_v48 }
  0x28   :  { %v157_v60 = vmul.f32 %v151_v14, %v143_v9  ;;  %v158_v0 = vmul.f32 %v152_v15, %v498_v10 }
  0x29   :  { %v163_v18 = vand.u32 2147483647, %v501_v16  ;;  %v164_v19 = vand.u32 2147483647, %v503_v17  ;;  %v159_v35 = vsub.f32 0.0, %v501_v16  ;;  %v160_v40 = vsub.f32 0.0, %v503_v17 }
  0x2b   :  { %v165_v20 = vsub.f32 0.0, %v163_v18  ;;  %v166_v21 = vsub.f32 0.0, %v164_v19  ;;  %v161_v45 = vmax.f32 %v159_v35, 0.0  ;;  %v162_v49 = vmax.f32 %v160_v40, 0.0 }
  0x2d   :  { %v167_v22 = vmul.f32 1.442695, %v165_v20  ;;  %v169_v23 = vmul.f32 1.442695, %v166_v21 }
  0x2f   :  { %263 = vpow2.f32 %v167_v22 }
  0x30   :  { %265 = vpow2.f32 %v169_v23 }
  0x35   :  { %v264_v24 = vpop.eup %263 }
  0x36   :  { %v266_v25 = vpop.eup %265  ;;  %v171_v26 = vadd.f32 1.0, %v264_v24  ;;  %v174_v27 = vmul.f32 -0.5, %v264_v24  ;;  %v177_v36 = vand.u32 2147483647, %v264_v24 }
  0x37   :  { %v180_v30 = vadd.f32 1.0, %v266_v25  ;;  %v183_v31 = vmul.f32 -0.5, %v266_v25  ;;  %v186_v41 = vand.u32 2147483647, %v266_v25 }
  0x38   :  { %267 = vlog2.f32 %v171_v26  ;;  %v175_v33 = vadd.f32 1.0, %v174_v27  ;;  %vm178_vm2 = vcmp.lt.f32.partialorder %v177_v36, 0.0004427343 }
  0x39   :  { %269 = vlog2.f32 %v180_v30  ;;  %v184_v37 = vadd.f32 1.0, %v183_v31  ;;  %vm187_vm3 = vcmp.lt.f32.partialorder %v186_v41, 0.0004427343 }
  0x3a   :  { %v176_v42 = vmul.f32 %v264_v24, %v175_v33 }
  0x3b   :  { %v185_v46 = vmul.f32 %v266_v25, %v184_v37 }
  0x3e   :  { %v268_v43 = vpop.eup %267 }
  0x3f   :  { %v270_v47 = vpop.eup %269  ;;  %v173_v50 = vmul.f32 0.6931472, %v268_v43 }
  0x40   :  { %v182_v51 = vmul.f32 0.6931472, %v270_v47 }
  0x41   :  { %v179_v52 = vsel %vm178_vm2, %v176_v42, %v173_v50 }
  0x42   :  { %v188_v54 = vsel %vm187_vm3, %v185_v46, %v182_v51  ;;  %v189_v55 = vadd.f32 %v179_v52, %v161_v45 }
  0x43   :  { %v190_v57 = vadd.f32 %v188_v54, %v162_v49 }
  0x44   :  { %v191_v58 = vadd.f32 %v189_v55, %v501_v16  ;;  %v193_v59 = vsub.f32 %v189_v55, %v501_v16  ;;  %v199_v61 = vmul.f32 0.5, %v189_v55 }
  0x45   :  { %v192_v62 = vadd.f32 %v190_v57, %v503_v17  ;;  %v194_v63 = vsub.f32 %v190_v57, %v503_v17  ;;  %v200_v1 = vmul.f32 0.5, %v190_v57 }
  0x46   :  { %v195_v2 = vmul.f32 %v193_v59, %v155_v53  ;;  %v201_v3 = vsub.f32 %v199_v61, %v501_v16 }
  0x47   :  { %v196_v4 = vmul.f32 %v194_v63, %v156_v56  ;;  %v202_v5 = vsub.f32 %v200_v1, %v503_v17 }
  0x48   :  { %v197_v6 = vadd.f32 %v195_v2, %v191_v58  ;;  %v203_v7 = vmul.f32 %v201_v3, %v157_v60 }
  0x49   :  { %v198_v8 = vadd.f32 %v196_v4, %v192_v62  ;;  %v204_v11 = vmul.f32 %v202_v5, %v158_v0 }
  0x4a   :  { %v205_v12 = vadd.f32 %v203_v7, %v191_v58 }
  0x4b   :  { %v208_v9 = vadd.f32 %v198_v8, %v197_v6  ;;  %v206_v10 = vadd.f32 %v204_v11, %v192_v62 }
  0x4d   :  { %v212_v13 = vadd.f32 %v206_v10, %v205_v12  ;;  %210 = vst [vmem:[#allocation12] sm:$0xff] %v208_v9 }
  0x4e   :  { %225 = dma.vmem_to_hbm [thread:$0]  %s221_s23, 128, %s223_s26, [#allocation6]  }
  0x4f   :  { %214 = vst [vmem:[#allocation13] sm:$0xff] %v212_v13 }
  0x50   :  { %236 = dma.vmem_to_hbm [thread:$0]  %s232_s28, 128, %s234_s30, [#allocation14]  }
  0x51   :  { %435 = dma.done.wait [#allocation6], 128  }
  0x52   :  { %436 = vsyncadd [#allocation6], 4294967168 }
  0x53   :  { %437 = dma.done.wait [#allocation14], 128  }
  0x54   :  { %438 = vsyncadd [#allocation14], 4294967168 }
  0x55   :  { %245 = vsyncpa [#allocation5], 1 }
  0x56   :  { %246 = vsyncpa [#allocation8], 1 }
  0x57   :  { %247 = vsyncpa [#allocation11], 1 }
  0x58   :  { %248 = vsyncpa [#allocation6], 1 }
  0x59   :  { %249 = vsyncpa [#allocation14], 1 }

</bundles_post_ra>
